<compile_context>
chip_gen: v7x
topology: tpu7x:2x2x1
jax: 0.10.0
libtpu: 0.0.40
codegen_flags: <defaults>
</compile_context>

<pallas_src>
import functools
import math

import jax
import jax.numpy as jnp
from jax.experimental import pallas as pl
from jax.experimental.pallas import tpu as pltpu


def _mean_only_bn_kernel(x_ref, bias_ref, o_ref, *, inv_hw):
    # x_ref:    (TILE, HW)  row-tiled block, lane-dense spatial axis
    # bias_ref: (TILE, 1)   per-row bias in f32 (bias[c] replicated over rows)
    x = x_ref[...].astype(jnp.float32)
    mean = jnp.sum(x, axis=1, keepdims=True) * inv_hw          # (TILE, 1)
    shift = bias_ref[...] - mean                               # fused: one add / element
    o_ref[...] = (x + shift).astype(o_ref.dtype)


def mean_only_batch_norm(x, bias, *, block_bytes=8 * 1024 * 1024):
    """x: (N, C, H, W); bias: (C,).  out = x - mean_{HW}(x) + bias[c]."""
    N, C, H, W = x.shape
    assert bias.shape == (C,)
    HW = H * W
    rows = N * C
    itemsize = jnp.dtype(x.dtype).itemsize

    # Sublane-packing alignment of the row tile (8 f32 / 16 bf16 / 32 int8|fp8).
    align = {4: 8, 2: 16, 1: 32}.get(itemsize, 8)

    # Row tile from the byte budget; cap so the parallel grid has >= 2 steps
    # whenever rows allow it (v7x has 2 TensorCores to shard across).
    row_bytes = HW * itemsize
    tile = max(1, block_bytes // row_bytes)
    tile = min(tile, max(1, pl.cdiv(rows, 2)), rows)

    # Bias residency: if tile can be a multiple of lcm(align, C) (C is small in
    # practice), one (tile, 1) bias pattern stays resident for the whole grid.
    lcm_bc = align * C // math.gcd(align, C)
    resident_bias = lcm_bc * row_bytes <= 2 * block_bytes
    step = lcm_bc if resident_bias else align
    tile = max(step, (tile // step) * step)

    grid = (pl.cdiv(rows, tile),)
    blk_bytes = tile * row_bytes
    # in + out double-buffered (~4x block) + bias + slack; never clamp below
    # what the buffers need (only near physical VMEM).
    vmem_limit = int(min(max(32 << 20, 4 * blk_bytes + (4 << 20)), 96 << 20))
    # TODO(synk): add an HW-split path (second 'arbitrary' grid axis + (tile,1)
    # f32 row-sum scratch) for very large H*W where even an 8-row block
    # overflows VMEM (notably v7x's 64 MiB).

    bias_f32 = bias.astype(jnp.float32)
    if resident_bias:
        # Single (tile, 1) channel pattern; index_map (0, 0) keeps it resident.
        bias_arg = jnp.tile(bias_f32, tile // C).reshape(tile, 1)
        bias_spec = pl.BlockSpec((tile, 1), lambda i: (0, 0))
    else:
        bias_arg = jnp.tile(bias_f32, N).reshape(rows, 1)
        bias_spec = pl.BlockSpec((tile, 1), lambda i: (i, 0))

    x_flat = x.reshape(rows, HW)  # contiguous reshape, no data movement
    kernel = functools.partial(_mean_only_bn_kernel, inv_hw=1.0 / HW)

    out_flat = pl.pallas_call(
        kernel,
        out_shape=jax.ShapeDtypeStruct((rows, HW), x.dtype),
        grid_spec=pltpu.PrefetchScalarGridSpec(
            num_scalar_prefetch=0,
            grid=grid,
            in_specs=[
                pl.BlockSpec((tile, HW), lambda i: (i, 0)),
                bias_spec,
            ],
            out_specs=pl.BlockSpec((tile, HW), lambda i: (i, 0)),
        ),
        compiler_params=pltpu.CompilerParams(
            dimension_semantics=("parallel",),
            vmem_limit_bytes=vmem_limit,
        ),
        cost_estimate=pl.CostEstimate(
            flops=2 * rows * HW,
            bytes_accessed=2 * rows * HW * itemsize + rows * 4,
            transcendentals=0,
        ),
    )(x_flat, bias_arg)

    return out_flat.reshape(N, C, H, W)


if __name__ == "__main__":
    key = jax.random.PRNGKey(0)
    N, C, H, W = 2, 4, 16, 16
    kx, kb = jax.random.split(key)

    x = jax.random.normal(kx, (N, C, H, W), dtype=jnp.float32)

    def ref_fn(x, bias):
        avg = jnp.mean(x.reshape(N, C, -1), axis=2).reshape(N, C, 1, 1)
        return x - avg + bias.reshape(1, C, 1, 1)

    # 1) Parameter init matches PyTorch: bias.data.zero_()
    bias0 = jnp.zeros((C,), dtype=jnp.float32)
    out0 = jax.block_until_ready(mean_only_batch_norm(x, bias0))
    assert out0.shape == (N, C, H, W)
    assert jnp.allclose(out0, ref_fn(x, bias0), atol=1e-5), "mismatch (zero bias)"

    # 2) Nonzero bias exercises the fused (bias - mean) shift path.
    bias1 = jax.random.normal(kb, (C,), dtype=jnp.float32)
    out1 = jax.block_until_ready(mean_only_batch_norm(x, bias1))
    assert jnp.allclose(out1, ref_fn(x, bias1), atol=1e-5), "mismatch (random bias)"

    print("KERNEL_OK")
</pallas_src>

<mosaic_0001>
module attributes {stable_mosaic.version = 11 : i64} {
  func.func @_mean_only_bn_kernel(%arg0: i32, %arg1: memref<8x256xf32, #tpu.memory_space<vmem>>, %arg2: memref<8x1xf32, #tpu.memory_space<vmem>>, %arg3: memref<8x256xf32, #tpu.memory_space<vmem>>) attributes {dimension_semantics = [#tpu.dimension_semantics<parallel>], iteration_bounds = array<i64: 1>, scalar_prefetch = 0 : i64, scratch_operands = 0 : i64, tpu.core_type = #tpu.core_type<tc>, window_params = [{transform_indices = @transform_0, window_bounds = array<i64: 8, 256>}, {pipeline_mode = #tpu.pipeline_mode<synchronous>, transform_indices = @transform_1, window_bounds = array<i64: 8, 1>}, {transform_indices = @transform_2, window_bounds = array<i64: 8, 256>}]} {
    %c0 = arith.constant 0 : index
    %c0_0 = arith.constant 0 : index
    %0 = vector.load %arg1[%c0, %c0_0] : memref<8x256xf32, #tpu.memory_space<vmem>>, vector<8x256xf32>
    %cst = arith.constant dense<0.000000e+00> : vector<8xf32>
    %1 = vector.multi_reduction <add>, %0, %cst [1] : vector<8x256xf32> to vector<8xf32>
    %2 = vector.shape_cast %1 : vector<8xf32> to vector<8x1xf32>
    %cst_1 = arith.constant 3.906250e-03 : f32
    %3 = vector.broadcast %cst_1 : f32 to vector<8x1xf32>
    %4 = arith.mulf %2, %3 : vector<8x1xf32>
    %c0_2 = arith.constant 0 : index
    %c0_3 = arith.constant 0 : index
    %5 = vector.load %arg2[%c0_2, %c0_3] : memref<8x1xf32, #tpu.memory_space<vmem>>, vector<8x1xf32>
    %6 = arith.subf %5, %4 : vector<8x1xf32>
    %7 = vector.broadcast %6 : vector<8x1xf32> to vector<8x256xf32>
    %8 = arith.addf %0, %7 : vector<8x256xf32>
    %c0_4 = arith.constant 0 : index
    %c0_5 = arith.constant 0 : index
    %9 = vector.load %arg3[%c0_4, %c0_5] : memref<8x256xf32, #tpu.memory_space<vmem>>, vector<8x256xf32>
    tpu.vector_store %arg3[%c0_4, %c0_5], %8 {strides = array<i32>} : memref<8x256xf32, #tpu.memory_space<vmem>>, vector<8x256xf32>,
    return
  }
  func.func @transform_0(%arg0: i32) -> (i32, i32) {
    %c0_i32 = arith.constant 0 : i32
    %c0_i32_0 = arith.constant 0 : i32
    return %arg0, %c0_i32 : i32, i32
  }
  func.func @transform_1(%arg0: i32) -> (i32, i32) {
    %c0_i32 = arith.constant 0 : i32
    %c0_i32_0 = arith.constant 0 : i32
    %c0_i32_1 = arith.constant 0 : i32
    return %c0_i32, %c0_i32_0 : i32, i32
  }
  func.func @transform_2(%arg0: i32) -> (i32, i32) {
    %c0_i32 = arith.constant 0 : i32
    %c0_i32_0 = arith.constant 0 : i32
    return %arg0, %c0_i32 : i32, i32
  }
}

</mosaic_0001>

<bundles_post_ra>
// kernel: tpu_custom_call.1
= control target key start
LH: loop header
LB: loop body
LE: loop exit
PB: predicated region body
PF: predicated region fallthrough
CT: control target
= control target key end

     0   :  { %7 = vsyncpa [#allocation3], 0  ;;  %s153_s0 = inlined_call_operand.hbm [shape: f32[8,256], index: 0, kind: input, shape index: {}]   ;;  %s154_s1 = inlined_call_operand.vmem [shape: f32[8,1], index: 1, kind: input, shape index: {}]   ;;  %s155_s2 = inlined_call_operand.hbm [shape: f32[8,256], index: 2, kind: output, shape index: {}]  }
   0x1   :  { %8 = vsyncpa [#allocation4], 0  ;;  %s108_s9 = smov [#allocation2]   ;;  %s60_s13 = scalar_lea.hbm %s153_s0, 256 }
   0x2   :  { %s15_s10 = sshll.u32 %s108_s9, 4  ;;  %p61_p0 = scmp.ne.s32.totalorder %s153_s0, %s60_s13  ;;  %s16_s10 = int_to_ptr.vmem [resolvable:$true] %s15_s10 }
   0x3   :  { %p64_p1 = scmp.lt.u32.totalorder %s60_s13, %s153_s0 }
   0x5   :  { %p66_p2 = pnand %p64_p1, %p61_p0 }
   0x7   :  { %69 = shalt.err (!%p66_p2)
}
   0x8   :  { %s70_s18 = scalar_lea.vmem %s16_s10, 256  ;;  %p75_p4 = scmp.lt.s32.totalorder %s16_s10, %s16_s10 }
   0x9   :  { %p71_p3 = scmp.ne.s32.totalorder %s16_s10, %s70_s18  ;;  %p76_p5 = scmp.lt.s32.totalorder %s70_s18, %s70_s18 }
   0xb   :  { %p77_p6 = por %p76_p5, %p75_p4 }
   0xd   :  { %p78_p7 = pnand %p77_p6, %p71_p3 }
   0xf   :  { %81 = shalt.err (!%p78_p7)
}
  0x10   :  { %18 = dma.hbm_to_vmem [thread:$0]  %s153_s0, 256, %s16_s10, [#allocation3]  }
  0x11   :  { %104 = dma.done.wait [#allocation3], 256  }
  0x12   :  { %105 = vsyncadd [#allocation3], 4294967040  ;;  %v24_v0 = vld [vmem:[#allocation2] sm:$0xff]  ;;  %v25_v1 = vld [vmem:[#allocation2 + $0x8] sm:$0xff]  ;;  %v109_v3 = vmov 0   ;;  %s110_s23 = smov [#allocation5]  }
  0x13   :  { %v26_v2 = vadd.f32 %v25_v1, %v24_v0  ;;  %59 = vset.pattern.permute.xlu0 %v109_v3  ;;  %v30_v4 = vld [vmem:[%s154_s1] sm:$0xff]  ;;  %s47_s24 = sshll.u32 %s110_s23, 4  ;;  %s48_s24 = int_to_ptr.vmem [resolvable:$true] %s47_s24 }
  0x14   :  { %s82_s0 = scalar_lea.vmem %s48_s24, 256  ;;  %p87_p9 = scmp.lt.s32.totalorder %s48_s24, %s48_s24 }
  0x15   :  { %27 = vadd.xlane.f32.xlu0 %v26_v2  ;;  %p83_p8 = scmp.ne.s32.totalorder %s48_s24, %s82_s0  ;;  %p88_p10 = scmp.lt.s32.totalorder %s82_s0, %s82_s0 }
  0x17   :  { %p89_p11 = por %p88_p10, %p87_p9 }
  0x19   :  { %p90_p12 = pnand %p89_p11, %p83_p8 }
  0xa2   :  { %v28_v5 = vpop.xlane.xlu0 %27 }
  0xa3   :  { %v29_v6 = vmul.f32 0.00390625, %v28_v5 }
  0xa5   :  { %v31_v7 = vsub.f32 %v30_v4, %v29_v6 }
  0xa7   :  { %34 = vperm.xlu0 %59, %v31_v7  }
 0x126   :  { %v35_v8 = vpop.permute.xlu0 %34 }
 0x127   :  { %v37_v9 = vadd.f32 %v35_v8, %v24_v0  ;;  %v38_v10 = vadd.f32 %v35_v8, %v25_v1 }
 0x129   :  { %39 = vst [vmem:[#allocation5] sm:$0xff] %v37_v9  ;;  %40 = vst [vmem:[#allocation5 + $0x8] sm:$0xff] %v38_v10 }
 0x12a   :  { %93 = shalt.err (!%p90_p12)
}
 0x12b   :  { %s94_s26 = scalar_lea.hbm %s155_s2, 256 }
 0x12c   :  { %p95_p13 = scmp.ne.s32.totalorder %s155_s2, %s94_s26  ;;  %p98_p0 = scmp.lt.u32.totalorder %s94_s26, %s155_s2 }
 0x12e   :  { %p100_p1 = pnand %p98_p0, %p95_p13 }
 0x130   :  { %103 = shalt.err (!%p100_p1)
}
 0x131   :  { %50 = dma.vmem_to_hbm [thread:$0]  %s48_s24, 256, %s155_s2, [#allocation4]  }
 0x132   :  { %106 = dma.done.wait [#allocation4], 256  }
 0x133   :  { %107 = vsyncadd [#allocation4], 4294967040 }
 0x134   :  { %54 = vsyncpa [#allocation3], 1 }
 0x135   :  { %55 = vsyncpa [#allocation4], 1 }

</bundles_post_ra>
